<compile_context>
chip_gen: v6e
topology: v6e:2x2x1
jax: 0.10.0
libtpu: 0.0.40
codegen_flags: <defaults>
</compile_context>

<pallas_src>
import math
from functools import partial

import jax
import jax.numpy as jnp
from jax.experimental import pallas as pl
from jax.experimental.pallas import tpu as pltpu


def _attn_kernel(q_ref, k_ref, x_ref, o_ref, *, head_dim):
    """y[g] = softmax((q @ k) / sqrt(Dh))[g or 0] @ x[g or 0].

    q_ref: (H, H)       -- query.view(H,1,Dh) with Dh == H (torch.matmul constraint)
    k_ref: (H, Dh)
    x_ref: (B, Dh, S)   -- B == 1 or B == H (torch batch broadcast of the final matmul)
    o_ref: (max(H,B), S)
    """
    B = x_ref.shape[0]

    # scores = (query.view(H,1,Dh) @ key) / sqrt(Dh)  -> (H, Dh).  One small MXU dot.
    scores = jnp.dot(q_ref[...], k_ref[...], preferred_element_type=jnp.float32)
    scores = scores * (1.0 / math.sqrt(head_dim))
    # TODO(synk): training-mode torch.nn.Dropout(dropout_p) is not modeled (eval-mode identity).

    # Numerically stable softmax along Dh, exact divide (tolerance-safe, free here).
    scores = scores - jnp.max(scores, axis=-1, keepdims=True)
    e = jnp.exp(scores)
    attn = e / jnp.sum(e, axis=-1, keepdims=True)          # (H, Dh)

    if B == 1:
        # y = attn @ x[0]: one merged MXU dot instead of per-batch M=1 dots.
        o_ref[...] = jnp.dot(attn, x_ref[0],
                             preferred_element_type=jnp.float32).astype(o_ref.dtype)
    else:
        # H == B: y[b] = attn[b] @ x[b].  Dh is tiny (== H), so keep the contraction on
        # the VPU: Dh broadcast-multiply-adds in otherwise idle VALU slots — no MXU
        # fill/drain and no per-batch result-FIFO pops.
        acc = attn[:, 0:1] * x_ref[:, 0, :]
        for d in range(1, head_dim):
            acc = acc + attn[:, d:d + 1] * x_ref[:, d, :]
        o_ref[...] = acc.astype(o_ref.dtype)


def model_forward(query, key_p, x, *, num_heads, in_features):
    """Eval-mode forward pass of the PyTorch Model."""
    H = num_heads
    head_dim = in_features // H
    B, x_mid, S = x.shape
    assert x_mid == head_dim, (
        f"x middle dim ({x_mid}) must equal head_dim ({head_dim}) for the final matmul")

    if H == 1 and head_dim == 1:
        # Deployed config: softmax over one logit == 1.0 exactly and eval-mode dropout
        # is identity, so y == x.  Short-circuit at trace time: no Pallas launch, no
        # pad/slice HLOs, no extra HBM round trip.
        return x.astype(jnp.float32)

    # torch.matmul(query.view(H,1,Dh), key(H,Dh)) contracts Dh against key's leading H.
    assert head_dim == H, (
        f"torch.matmul((H,1,{head_dim}), ({H},{head_dim})) requires head_dim == num_heads")
    # Final batched matmul broadcast (H,1,Dh) @ (B,Dh,S): model B == 1 and B == H.
    assert B == 1 or B == H, f"batch broadcast needs x.shape[0] in (1, {H}); got {B}"

    q2d = query.reshape(H, head_dim)          # (H, H)
    out_rows = max(H, B)

    # Tiny problem: single grid-less pallas_call, everything VMEM-resident, unpadded
    # (possibly masked) store.  TODO(synk): for large S, switch to a 1-D "parallel"
    # grid over S with lane-dense (out_rows, TS) blocks (TS ~ 1024) and an explicit
    # vmem_limit_bytes so the resident design stays under v7x's 64 MiB VMEM
    # (and v5e's 16 MiB scoped default).
    y2d = pl.pallas_call(
        partial(_attn_kernel, head_dim=head_dim),
        out_shape=jax.ShapeDtypeStruct((out_rows, S), jnp.float32),
        in_specs=[
            pl.BlockSpec(memory_space=pltpu.MemorySpace.VMEM),
            pl.BlockSpec(memory_space=pltpu.MemorySpace.VMEM),
            pl.BlockSpec(memory_space=pltpu.MemorySpace.VMEM),
        ],
        out_specs=pl.BlockSpec(memory_space=pltpu.MemorySpace.VMEM),
    )(q2d, key_p, x)

    return y2d[:, None, :]                    # (max(H,B), 1, S); expand_dims is metadata-only


def _model_forward_ref(query, key_p, x, *, num_heads, in_features):
    """Pure-JAX reference of the same eval-mode forward pass."""
    head_dim = in_features // num_heads
    q = query.reshape(num_heads, 1, head_dim)
    scores = jnp.matmul(q, key_p) / math.sqrt(head_dim)
    attn = jax.nn.softmax(scores, axis=-1)
    return jnp.matmul(attn, x)


if __name__ == "__main__":
    # --- Deployed module constants (from the PyTorch source) --------------------------
    dropout_p = 1          # eval-mode dropout is identity; training mode not modeled
    in_features = 1
    num_heads = 1
    head_dim = in_features // num_heads   # 1

    root = jax.random.PRNGKey(0)
    k1, k2, k3, k4 = jax.random.split(root, 4)
    query = jax.random.normal(k1, (in_features,), dtype=jnp.float32)
    key_p = jax.random.normal(k2, (num_heads, head_dim), dtype=jnp.float32)
    value_p = jax.random.normal(k3, (num_heads, head_dim), dtype=jnp.float32)  # unused in forward
    x = jax.random.normal(k4, (3, 1, 10), dtype=jnp.float32)

    y = model_forward(query, key_p, x, num_heads=num_heads, in_features=in_features)
    jax.block_until_ready(y)
    y_ref = _model_forward_ref(query, key_p, x, num_heads=num_heads, in_features=in_features)
    assert y.shape == (3, 1, 10), y.shape
    assert jnp.allclose(y, y_ref, atol=1e-6, rtol=1e-6), "deployed-config mismatch vs reference"

    # --- Exercise the Pallas kernel paths the deployed config short-circuits ----------
    # (a) B == 1  -> single merged MXU dot, lane-dense S = 128.
    in_f, H = 64, 8
    ka, kb, kc = jax.random.split(jax.random.PRNGKey(1), 3)
    q_a = jax.random.normal(ka, (in_f,), dtype=jnp.float32)
    key_a = jax.random.normal(kb, (H, in_f // H), dtype=jnp.float32)
    x_a = jax.random.normal(kc, (1, in_f // H, 128), dtype=jnp.float32)
    y_a = model_forward(q_a, key_a, x_a, num_heads=H, in_features=in_f)
    jax.block_until_ready(y_a)
    y_a_ref = _model_forward_ref(q_a, key_a, x_a, num_heads=H, in_features=in_f)
    assert y_a.shape == y_a_ref.shape == (H, 1, 128), (y_a.shape, y_a_ref.shape)
    assert jnp.allclose(y_a, y_a_ref, atol=1e-5, rtol=1e-5), "B==1 kernel mismatch vs reference"

    # (b) H == B  -> merged VPU broadcast-multiply accumulate (no per-batch MXU dots).
    kd, ke, kf = jax.random.split(jax.random.PRNGKey(2), 3)
    q_b = jax.random.normal(kd, (in_f,), dtype=jnp.float32)
    key_b = jax.random.normal(ke, (H, in_f // H), dtype=jnp.float32)
    x_b = jax.random.normal(kf, (H, in_f // H, 128), dtype=jnp.float32)
    y_b = model_forward(q_b, key_b, x_b, num_heads=H, in_features=in_f)
    jax.block_until_ready(y_b)
    y_b_ref = _model_forward_ref(q_b, key_b, x_b, num_heads=H, in_features=in_f)
    assert y_b.shape == y_b_ref.shape == (H, 1, 128), (y_b.shape, y_b_ref.shape)
    assert jnp.allclose(y_b, y_b_ref, atol=1e-5, rtol=1e-5), "H==B kernel mismatch vs reference"

    print("KERNEL_OK")
</pallas_src>

<mosaic_0001>
module attributes {stable_mosaic.version = 11 : i64} {
  func.func @_attn_kernel(%arg0: memref<8x8xf32, #tpu.memory_space<vmem>>, %arg1: memref<8x8xf32, #tpu.memory_space<vmem>>, %arg2: memref<1x8x128xf32, #tpu.memory_space<vmem>>, %arg3: memref<8x128xf32, #tpu.memory_space<vmem>>) attributes {dimension_semantics = [], scalar_prefetch = 0 : i64, scratch_operands = 0 : i64, tpu.core_type = #tpu.core_type<tc>} {
    %c0 = arith.constant 0 : index
    %c0_0 = arith.constant 0 : index
    %0 = vector.load %arg0[%c0, %c0_0] : memref<8x8xf32, #tpu.memory_space<vmem>>, vector<8x8xf32>
    %c0_1 = arith.constant 0 : index
    %c0_2 = arith.constant 0 : index
    %1 = vector.load %arg1[%c0_1, %c0_2] : memref<8x8xf32, #tpu.memory_space<vmem>>, vector<8x8xf32>
    %cst = arith.constant dense<0.000000e+00> : vector<8x8xf32>
    %2 = tpu.matmul %0, %1, %cst {dimension_numbers = #tpu.dot_dimension_numbers<[1], [0], [0], [1], [0, 0, 1, 1], [], []>} : vector<8x8xf32>, vector<8x8xf32>, vector<8x8xf32> -> vector<8x8xf32>
    %cst_3 = arith.constant 0.353553385 : f32
    %3 = vector.broadcast %cst_3 : f32 to vector<8x8xf32>
    %4 = arith.mulf %2, %3 : vector<8x8xf32>
    %cst_4 = arith.constant dense<0xFF800000> : vector<8xf32>
    %5 = vector.multi_reduction <maximumf>, %4, %cst_4 [1] : vector<8x8xf32> to vector<8xf32>
    %6 = vector.shape_cast %5 : vector<8xf32> to vector<8x1xf32>
    %7 = vector.broadcast %6 : vector<8x1xf32> to vector<8x8xf32>
    %8 = arith.subf %4, %7 : vector<8x8xf32>
    %9 = math.exp %8 : vector<8x8xf32>
    %cst_5 = arith.constant dense<0.000000e+00> : vector<8xf32>
    %10 = vector.multi_reduction <add>, %9, %cst_5 [1] : vector<8x8xf32> to vector<8xf32>
    %11 = vector.shape_cast %10 : vector<8xf32> to vector<8x1xf32>
    %12 = vector.broadcast %11 : vector<8x1xf32> to vector<8x8xf32>
    %13 = arith.divf %9, %12 : vector<8x8xf32>
    %c0_6 = arith.constant 0 : index
    %c0_7 = arith.constant 0 : index
    %c0_8 = arith.constant 0 : index
    %14 = vector.load %arg2[%c0_6, %c0_7, %c0_8] : memref<1x8x128xf32, #tpu.memory_space<vmem>>, vector<1x8x128xf32>
    %15 = vector.shape_cast %14 : vector<1x8x128xf32> to vector<8x128xf32>
    %cst_9 = arith.constant dense<0.000000e+00> : vector<8x128xf32>
    %16 = tpu.matmul %13, %15, %cst_9 {dimension_numbers = #tpu.dot_dimension_numbers<[1], [0], [0], [1], [0, 0, 1, 1], [], []>} : vector<8x8xf32>, vector<8x128xf32>, vector<8x128xf32> -> vector<8x128xf32>
    %c0_10 = arith.constant 0 : index
    %c0_11 = arith.constant 0 : index
    %17 = vector.load %arg3[%c0_10, %c0_11] : memref<8x128xf32, #tpu.memory_space<vmem>>, vector<8x128xf32>
    tpu.vector_store %arg3[%c0_10, %c0_11], %16 {strides = array<i32>} : memref<8x128xf32, #tpu.memory_space<vmem>>, vector<8x128xf32>,
    return
  }
}

</mosaic_0001>

<bundles_post_ra>
// kernel: tpu_custom_call.1
= control target key start
LH: loop header
LB: loop body
LE: loop exit
PB: predicated region body
PF: predicated region fallthrough
CT: control target
= control target key end

     0   :  { %8 = vsyncpa [#allocation3], 0  ;;  %s383_s0 = inlined_call_operand.hbm [shape: f32[8,8], index: 0, kind: input, shape index: {}]   ;;  %s384_s1 = inlined_call_operand.hbm [shape: f32[8,8], index: 1, kind: input, shape index: {}]   ;;  %s385_s2 = inlined_call_operand.hbm [shape: f32[1,8,128], index: 2, kind: input, shape index: {}]   ;;  %s386_s3 = inlined_call_operand.hbm [shape: f32[8,128], index: 3, kind: output, shape index: {}]  }
   0x1   :  { %9 = vsyncpa [#allocation6], 0 }
   0x2   :  { %10 = vsyncpa [#allocation4], 0  ;;  %s341_s12 = smov [#allocation5]   ;;  %s342_s14 = smov [#allocation2]  }
   0x3   :  { %s27_s13 = sshll.u32 %s341_s12, 4  ;;  %s17_s15 = sshll.u32 %s342_s14, 4  ;;  %s28_s13 = int_to_ptr.vmem [resolvable:$true] %s27_s13  ;;  %s18_s15 = int_to_ptr.vmem [resolvable:$true] %s17_s15 }
   0x4   :  { %s263_s16 = scalar_lea.vmem %s28_s13, 128  ;;  %p268_p1 = scmp.lt.s32.totalorder %s28_s13, %s28_s13 }
   0x5   :  { %p264_p0 = scmp.ne.s32.totalorder %s28_s13, %s263_s16  ;;  %p269_p2 = scmp.lt.s32.totalorder %s263_s16, %s263_s16 }
   0x7   :  { %p270_p3 = por %p269_p2, %p268_p1 }
   0x9   :  { %p271_p4 = pnand %p270_p3, %p264_p0 }
   0xb   :  { %274 = shalt.err (!%p271_p4)
}
   0xc   :  { %30 = dma.hbm_to_vmem [thread:$0]  %s384_s1, 128, %s28_s13, [#allocation6]  }
   0xd   :  { %s283_s19 = scalar_lea.vmem %s18_s15, 128  ;;  %p288_p6 = scmp.lt.s32.totalorder %s18_s15, %s18_s15 }
   0xe   :  { %p284_p5 = scmp.ne.s32.totalorder %s18_s15, %s283_s19  ;;  %p289_p7 = scmp.lt.s32.totalorder %s283_s19, %s283_s19 }
  0x10   :  { %p290_p8 = por %p289_p7, %p288_p6 }
  0x12   :  { %p291_p9 = pnand %p290_p8, %p284_p5 }
  0x14   :  { %294 = shalt.err (!%p291_p9)
}
  0x15   :  { %20 = dma.hbm_to_vmem [thread:$0]  %s383_s0, 128, %s18_s15, [#allocation3]  }
  0x16   :  { %s343_s22 = smov [#allocation7]  }
  0x17   :  { %s37_s23 = sshll.u32 %s343_s22, 4  ;;  %s38_s23 = int_to_ptr.vmem [resolvable:$true] %s37_s23 }
  0x18   :  { %s303_s24 = scalar_lea.vmem %s38_s23, 128  ;;  %p308_p11 = scmp.lt.s32.totalorder %s38_s23, %s38_s23 }
  0x19   :  { %p304_p10 = scmp.ne.s32.totalorder %s38_s23, %s303_s24  ;;  %p309_p12 = scmp.lt.s32.totalorder %s303_s24, %s303_s24 }
  0x1b   :  { %p310_p13 = por %p309_p12, %p308_p11 }
  0x1d   :  { %p311_p0 = pnand %p310_p13, %p304_p10 }
  0x1f   :  { %314 = shalt.err (!%p311_p0)
}
  0x20   :  { %40 = dma.hbm_to_vmem [thread:$0]  %s385_s2, 128, %s38_s23, [#allocation6]  }
  0x21   :  { %335 = dma.done.wait [#allocation3], 128  }
  0x22   :  { %336 = vsyncadd [#allocation3], 4294967168 }
  0x23   :  { %337 = dma.done.wait [#allocation6], 256  }
  0x24   :  { %338 = vsyncadd [#allocation6], 4294967040  ;;  %v344_v0 = vmov 0.0   ;;  %vm345_vm0 = vmmov 0   ;;  %vm52_vm1 = vcmask 64512   ;;  %v51_v1 = vld [vmem:[#allocation5] sm:$0xff] }
  0x25   :  { %235 = vmatprep.subr.mxu0 %v344_v0  ;;  %237 = vmatprep.mubr.msk.f32.mxu0 %vm345_vm0, %v344_v0  ;;  %v50_v2 = vld [vmem:[#allocation2] sm:$0xff]  ;;  %v138_v12 = vld [vmem:[#allocation7] sm:$0xff]  ;;  %s346_s0 = smov [#allocation8]  }
  0x26   :  { %240 = vmatprep.subr.mxu1 %v344_v0  ;;  %242 = vmatprep.mubr.msk.f32.mxu1 %vm345_vm0, %v344_v0  ;;  %s219_s2 = sshll.u32 %s346_s0, 4  ;;  %s220_s2 = int_to_ptr.vmem [resolvable:$true] %s219_s2 }
  0x27   :  { %236 = vmatpush3.msra.mxu0 %v51_v1  ;;  %241 = vmatpush3.msra.mxu1 %v138_v12  ;;  %s315_s26 = scalar_lea.vmem %s220_s2, 128  ;;  %p320_p2 = scmp.lt.s32.totalorder %s220_s2, %s220_s2 }
  0x28   :  { %238 = vmatmul.mubr.msk.f32.vlgmr.msra.gmra.mxu0 %vm52_vm1, %v50_v2  ;;  %p316_p1 = scmp.ne.s32.totalorder %s220_s2, %s315_s26  ;;  %p321_p3 = scmp.lt.s32.totalorder %s315_s26, %s315_s26 }
  0x2a   :  { %p322_p4 = por %p321_p3, %p320_p2 }
  0x2c   :  { %p323_p5 = pnand %p322_p4, %p316_p1 }
  0xe8   :  { %v122_v3 = vpop.f32.mrf.mxu0 }
  0xe9   :  { %v126_v4 = vmul.f32 0.35355338, %v122_v3 }
  0xea   :  { %v239_v5 = vpop.f32.mrf.mxu0 }
  0xeb   :  { %v127_v6 = vsel %vm52_vm1, %v126_v4, -inf }
  0xec   :  { %128 = vmax.xlane.f32.xlu0 %v127_v6 }
 0x175   :  { %v129_v7 = vpop.xlane.xlu0 %128 }
 0x176   :  { %v130_v8 = vsub.f32 %v126_v4, %v129_v7 }
 0x178   :  { %v131_v9 = vmul.f32 1.442695, %v130_v8 }
 0x17a   :  { %251 = vpow2.f32 %v131_v9 }
 0x187   :  { %v252_v10 = vpop.eup %251 }
 0x188   :  { %v133_v11 = vsel %vm52_vm1, %v252_v10, 0.0 }
 0x189   :  { %134 = vadd.xlane.f32.xlu0 %v133_v11 }
 0x212   :  { %v135_v13 = vpop.xlane.xlu0 %134 }
 0x213   :  { %253 = vrcp.f32 %v135_v13 }
 0x220   :  { %v254_v14 = vpop.eup %253 }
 0x221   :  { %v137_v15 = vmul.f32 %v254_v14, %v252_v10 }
 0x223   :  { %243 = vmatmul.mubr.msk.f32.vlgmr.msra.gmra.mxu1 %vm52_vm1, %v137_v15 }
 0x2e3   :  { %v208_v16 = vpop.f32.mrf.mxu1 }
 0x2e4   :  { %212 = vst [vmem:[#allocation8] sm:$0xff] %v208_v16 }
 0x2e5   :  { %v244_v17 = vpop.f32.mrf.mxu1 }
 0x2e6   :  { %326 = shalt.err (!%p323_p5)
}
 0x2e7   :  { %222 = dma.vmem_to_hbm [thread:$0]  %s220_s2, 128, %s386_s3, [#allocation4]  }
 0x2e8   :  { %339 = dma.done.wait [#allocation4], 128  }
 0x2e9   :  { %340 = vsyncadd [#allocation4], 4294967168 }
 0x2ea   :  { %226 = vsyncpa [#allocation3], 1 }
 0x2eb   :  { %227 = vsyncpa [#allocation6], 1 }
 0x2ec   :  { %228 = vsyncpa [#allocation4], 1 }

</bundles_post_ra>
